<compile_context>
chip_gen: v7x
topology: tpu7x:2x2x1
jax: 0.10.0
libtpu: 0.0.40
codegen_flags: <defaults>
</compile_context>

<pallas_src>
import functools

import jax
import jax.numpy as jnp
from jax.experimental import pallas as pl
from jax.experimental.pallas import tpu as pltpu


def _round_up(x, m):
    return ((x + m - 1) // m) * m


# ----------------------------- Kernel 1: hyper MLP -----------------------------
def _mlp_kernel(feat_ref, w1_ref, b1_ref, w2_ref, b2_ref, out_ref):
    h = jnp.dot(feat_ref[...], w1_ref[...], preferred_element_type=jnp.float32)
    h = jnp.maximum(h + b1_ref[...], 0.0)
    o = jnp.dot(h, w2_ref[...], preferred_element_type=jnp.float32)
    out_ref[...] = o + b2_ref[...]


_MLP_VMEM_BUDGET_BYTES = 8 * 1024 * 1024  # stay well under any scoped-VMEM default


def mlp_forward(features, w1, b1, w2, b2):
    B = features.shape[0]
    Hdim = w2.shape[1]
    weight_bytes = 4 * (w1.size + w2.size + b1.size + b2.size)
    if weight_bytes > _MLP_VMEM_BUDGET_BYTES:
        # Scalability path: the (3D^3, 3D^3) weight would not fit a single VMEM
        # block and batch is tiny anyway -> not a bottleneck, let XLA do it.
        h = jnp.maximum(features @ w1 + b1, 0.0)
        return h @ w2 + b2
    return pl.pallas_call(
        _mlp_kernel,
        out_shape=jax.ShapeDtypeStruct((B, Hdim), jnp.float32),
    )(features, w1, b1, w2, b2)


# ------------------------ Kernel 2: trilinear LUT apply ------------------------
def _hat(x, level):
    # 1-D tent weight; with border clamping these equal linear-interp weights.
    return jnp.maximum(1.0 - jnp.abs(x - level), 0.0)


def _lut_apply_kernel(lut_ref, img_ref, out_ref, *, lut_dim):
    D = lut_dim
    half = 0.5 * (D - 1)

    # normalize(img,'inv') ([-1,1]->[0,1]) fused with the align_corners=True
    # coordinate map and the padding_mode='border' clamp:
    #   idx = clip(img01 * (D-1), 0, D-1) = clip(img*half + half, 0, D-1)
    idx = jnp.clip(img_ref[...] * half + half, 0.0, float(D - 1))       # (3, TP)
    idx_r = idx[0:1, :]   # R -> outermost LUT spatial axis (i)
    idx_g = idx[1:2, :]   # G -> middle axis (j)
    idx_b = idx[2:3, :]   # B -> innermost axis (k)

    # Per-axis hat weights against compile-time level constants.
    wb = jnp.concatenate([_hat(idx_b, float(k)) for k in range(D)], axis=0)       # (D, TP)
    # Kronecker weights for the fused G+B contraction: wgb[(j,k),p]=wg[j,p]*wb[k,p]
    wgb = jnp.concatenate([_hat(idx_g, float(j)) * wb for j in range(D)], axis=0)  # (D*D, TP)

    # MXU: contract the G and B LUT axes in one matmul.
    # lut_ref is (8*D, D*D): rows ordered (i, c_padded_to_8), cols ordered (j, k).
    t1 = jnp.dot(lut_ref[...], wgb, preferred_element_type=jnp.float32)  # (8*D, TP)

    # Remaining R-axis contraction, unrolled; slices are 8-sublane aligned.
    acc = None
    for i in range(D):
        part = t1[8 * i:8 * (i + 1), :] * _hat(idx_r, float(i))          # (8, TP)
        acc = part if acc is None else acc + part

    # normalize(lut_transform_image, opt): [0,1] -> [-1,1]
    out_ref[...] = acc[0:3, :] * 2.0 - 1.0


def _pick_tile_p(P, D, B):
    # Per-lane f32 bytes resident per grid step for the fused separable kernel:
    #   t1 (8D) + wgb (D*D) + wb/idx (~D+3) + double-buffered (3,TP) in/out (~12)
    per_lane_bytes = 4 * (8 * D + D * D + D + 3 + 12)
    budget = 8 * 1024 * 1024            # safe under v5e's 16 MiB scoped default
    tp = (budget // per_lane_bytes // 128) * 128
    tp = max(512, min(8192, tp))
    tp = min(tp, _round_up(P, 128))
    if B == 1 and P > 128:
        # v7x megacore guard: ensure the grid has >= 2 steps so both TCs work.
        tp = min(tp, max(128, _round_up(pl.cdiv(P, 2), 128)))
    return tp


def lut_apply(lut2d, img_flat, lut_dim, tile_p):
    B, R, K = lut2d.shape               # R = 8*D, K = D*D
    _, _, P = img_flat.shape
    assert P % tile_p == 0 and tile_p % 128 == 0
    n_tiles = P // tile_p
    D = lut_dim
    kernel = functools.partial(_lut_apply_kernel, lut_dim=lut_dim)
    cost = pl.CostEstimate(
        flops=int(B * P * (2 * R * K + 6 * D * D + 30 * D)),
        transcendentals=0,
        bytes_accessed=int(4 * B * (2 * 3 * P + R * K)),
    )
    return pl.pallas_call(
        kernel,
        out_shape=jax.ShapeDtypeStruct((B, 3, P), jnp.float32),
        grid=(B, n_tiles),
        in_specs=[
            # LUT block index is invariant along the inner pixel axis -> DMA'd
            # once per image, not once per pixel tile.
            pl.BlockSpec((None, R, K), lambda b, p: (b, 0, 0)),
            pl.BlockSpec((None, 3, tile_p), lambda b, p: (b, 0, p)),
        ],
        out_specs=pl.BlockSpec((None, 3, tile_p), lambda b, p: (b, 0, p)),
        compiler_params=pltpu.CompilerParams(
            dimension_semantics=("parallel", "parallel"),
            vmem_limit_bytes=32 * 1024 * 1024,
        ),
        cost_estimate=cost,
    )(lut2d, img_flat)


# ------------------------------- Module wrapper --------------------------------
def init_params(key, input_dim, lut_dim):
    H = 3 * lut_dim ** 3
    k1, k2, k3, k4 = jax.random.split(key, 4)
    # Layer 1: PyTorch default init is random; small random here.
    w1 = jax.random.normal(k1, (input_dim, H), jnp.float32) * 0.05
    b1 = jax.random.normal(k2, (1, H), jnp.float32) * 0.01
    # Layer 2: hyper_weight_init -> kaiming_normal(fan_in, relu)/100, bias~U(0,1).
    std = jnp.sqrt(2.0 / H) / 100.0
    w2 = jax.random.normal(k3, (H, H), jnp.float32) * std
    b2 = jax.random.uniform(k4, (1, H), jnp.float32, 0.0, 1.0)
    return {"w1": w1, "b1": b1, "w2": w2, "b2": b2}


def build_lut_transform_forward(composite_image, fg_features, params, lut_dim):
    B, C, H, W = composite_image.shape
    assert C == 3
    D = lut_dim

    lut_params = mlp_forward(
        fg_features, params["w1"], params["b1"], params["w2"], params["b2"]
    )                                                      # (B, 3*D^3)
    fit_3dlut = lut_params.reshape(B, 3, D, D, D)          # axes (B, c, i, j, k)

    # Repack the LUT for the kernel: pad channels 3 -> 8 (sublane aligned so
    # in-kernel slices never relayout), rows ordered (i, c8), cols (j, k).
    # Tiny tensor, done once in XLA.
    lut_pad = jnp.pad(fit_3dlut, ((0, 0), (0, 8 - 3), (0, 0), (0, 0), (0, 0)))
    lut2d = jnp.transpose(lut_pad, (0, 2, 1, 3, 4)).reshape(B, 8 * D, D * D)

    # Pad the pixel axis to a multiple of the (128-aligned) tile for lane-dense
    # unmasked stores; padded pixels are sliced away afterwards.
    P = H * W
    tile_p = _pick_tile_p(P, D, B)
    P_pad = _round_up(P, tile_p)
    img_flat = composite_image.reshape(B, 3, P)
    if P_pad != P:
        img_flat = jnp.pad(img_flat, ((0, 0), (0, 0), (0, P_pad - P)))

    out_flat = lut_apply(lut2d, img_flat, D, tile_p)
    lut_img = out_flat[:, :, :P].reshape(B, 3, H, W)
    return fit_3dlut, lut_img


# ------------------------------ pure-JAX reference ------------------------------
def reference_forward(composite_image, features, params, lut_dim):
    D = lut_dim
    h = jnp.maximum(features @ params["w1"] + params["b1"][0], 0.0)
    lut_params = h @ params["w2"] + params["b2"][0]
    B = features.shape[0]
    fit = lut_params.reshape(B, 3, D, D, D)
    img01 = composite_image * 0.5 + 0.5
    outs = []
    for bi in range(B):
        lut, im = fit[bi], img01[bi]
        xr = jnp.clip(im[0] * (D - 1), 0.0, D - 1)
        xg = jnp.clip(im[1] * (D - 1), 0.0, D - 1)
        xb = jnp.clip(im[2] * (D - 1), 0.0, D - 1)
        i0 = jnp.floor(xr).astype(jnp.int32); i1 = jnp.minimum(i0 + 1, D - 1); fr = xr - i0
        j0 = jnp.floor(xg).astype(jnp.int32); j1 = jnp.minimum(j0 + 1, D - 1); fg = xg - j0
        k0 = jnp.floor(xb).astype(jnp.int32); k1 = jnp.minimum(k0 + 1, D - 1); fb = xb - k0
        g = lambda ii, jj, kk: lut[:, ii, jj, kk]
        out = (g(i0, j0, k0) * (1 - fr) * (1 - fg) * (1 - fb)
               + g(i1, j0, k0) * fr * (1 - fg) * (1 - fb)
               + g(i0, j1, k0) * (1 - fr) * fg * (1 - fb)
               + g(i0, j0, k1) * (1 - fr) * (1 - fg) * fb
               + g(i1, j1, k0) * fr * fg * (1 - fb)
               + g(i1, j0, k1) * fr * (1 - fg) * fb
               + g(i0, j1, k1) * (1 - fr) * fg * fb
               + g(i1, j1, k1) * fr * fg * fb)
        outs.append(out)
    return fit, (jnp.stack(outs, 0) - 0.5) * 2.0


# ------------------------------------ main ---------------------------------------
if __name__ == "__main__":
    B, C, Himg, Wimg = 2, 3, 16, 16
    input_dim, lut_dim = 32, 4

    key = jax.random.PRNGKey(0)
    kp, ki, kf = jax.random.split(key, 3)
    params = init_params(kp, input_dim, lut_dim)
    composite_image = jax.random.uniform(
        ki, (B, C, Himg, Wimg), jnp.float32, minval=-1.0, maxval=1.0
    )
    fg_features = jax.random.normal(kf, (B, input_dim), jnp.float32)

    fit_3dlut, lut_img = build_lut_transform_forward(
        composite_image, fg_features, params, lut_dim
    )
    jax.block_until_ready((fit_3dlut, lut_img))

    ref_fit, ref_img = reference_forward(composite_image, fg_features, params, lut_dim)
    assert fit_3dlut.shape == (B, 3, lut_dim, lut_dim, lut_dim)
    assert lut_img.shape == (B, 3, Himg, Wimg)
    assert jnp.allclose(fit_3dlut, ref_fit, atol=2e-3, rtol=2e-3)
    assert jnp.allclose(lut_img, ref_img, atol=2e-3, rtol=2e-3)

    print("KERNEL_OK")
</pallas_src>

<mosaic_0001>
module attributes {stable_mosaic.version = 11 : i64} {
  func.func @_mlp_kernel(%arg0: memref<2x32xf32, #tpu.memory_space<vmem>>, %arg1: memref<32x192xf32, #tpu.memory_space<vmem>>, %arg2: memref<1x192xf32, #tpu.memory_space<vmem>>, %arg3: memref<192x192xf32, #tpu.memory_space<vmem>>, %arg4: memref<1x192xf32, #tpu.memory_space<vmem>>, %arg5: memref<2x192xf32, #tpu.memory_space<vmem>>) attributes {dimension_semantics = [], scalar_prefetch = 0 : i64, scratch_operands = 0 : i64, tpu.core_type = #tpu.core_type<tc>} {
    %c0 = arith.constant 0 : index
    %c0_0 = arith.constant 0 : index
    %0 = vector.load %arg0[%c0, %c0_0] : memref<2x32xf32, #tpu.memory_space<vmem>>, vector<2x32xf32>
    %c0_1 = arith.constant 0 : index
    %c0_2 = arith.constant 0 : index
    %1 = vector.load %arg1[%c0_1, %c0_2] : memref<32x192xf32, #tpu.memory_space<vmem>>, vector<32x192xf32>
    %cst = arith.constant dense<0.000000e+00> : vector<2x192xf32>
    %2 = tpu.matmul %0, %1, %cst {dimension_numbers = #tpu.dot_dimension_numbers<[1], [0], [0], [1], [0, 0, 1, 1], [], []>} : vector<2x32xf32>, vector<32x192xf32>, vector<2x192xf32> -> vector<2x192xf32>
    %c0_3 = arith.constant 0 : index
    %c0_4 = arith.constant 0 : index
    %3 = vector.load %arg2[%c0_3, %c0_4] : memref<1x192xf32, #tpu.memory_space<vmem>>, vector<1x192xf32>
    %4 = vector.broadcast %3 : vector<1x192xf32> to vector<2x192xf32>
    %5 = arith.addf %2, %4 : vector<2x192xf32>
    %cst_5 = arith.constant 0.000000e+00 : f32
    %6 = vector.broadcast %cst_5 : f32 to vector<2x192xf32>
    %7 = arith.maximumf %5, %6 : vector<2x192xf32>
    %c0_6 = arith.constant 0 : index
    %c0_7 = arith.constant 0 : index
    %8 = vector.load %arg3[%c0_6, %c0_7] : memref<192x192xf32, #tpu.memory_space<vmem>>, vector<192x192xf32>
    %cst_8 = arith.constant dense<0.000000e+00> : vector<2x192xf32>
    %9 = tpu.matmul %7, %8, %cst_8 {dimension_numbers = #tpu.dot_dimension_numbers<[1], [0], [0], [1], [0, 0, 1, 1], [], []>} : vector<2x192xf32>, vector<192x192xf32>, vector<2x192xf32> -> vector<2x192xf32>
    %c0_9 = arith.constant 0 : index
    %c0_10 = arith.constant 0 : index
    %10 = vector.load %arg4[%c0_9, %c0_10] : memref<1x192xf32, #tpu.memory_space<vmem>>, vector<1x192xf32>
    %11 = vector.broadcast %10 : vector<1x192xf32> to vector<2x192xf32>
    %12 = arith.addf %9, %11 : vector<2x192xf32>
    %c0_11 = arith.constant 0 : index
    %c0_12 = arith.constant 0 : index
    %13 = vector.load %arg5[%c0_11, %c0_12] : memref<2x192xf32, #tpu.memory_space<vmem>>, vector<2x192xf32>
    tpu.vector_store %arg5[%c0_11, %c0_12], %12 {strides = array<i32>} : memref<2x192xf32, #tpu.memory_space<vmem>>, vector<2x192xf32>,
    return
  }
}

</mosaic_0001>

<bundles_post_ra>
// kernel: tpu_custom_call.1
= control target key start
LH: loop header
LB: loop body
LE: loop exit
PB: predicated region body
PF: predicated region fallthrough
CT: control target
= control target key end

     0   :  { %10 = vsyncpa [#allocation3], 0  ;;  %s582_s0 = inlined_call_operand.hbm [shape: f32[2,32], index: 0, kind: input, shape index: {}]   ;;  %s583_s1 = inlined_call_operand.hbm [shape: f32[32,192], index: 1, kind: input, shape index: {}]   ;;  %s584_s2 = inlined_call_operand.vmem [shape: f32[1,192], index: 2, kind: input, shape index: {}]   ;;  %s585_s3 = inlined_call_operand.hbm [shape: f32[192,192], index: 3, kind: input, shape index: {}]   ;;  %s586_s4 = inlined_call_operand.vmem [shape: f32[1,192], index: 4, kind: input, shape index: {}]   ;;  %s587_s5 = inlined_call_operand.hbm [shape: f32[2,192], index: 5, kind: output, shape index: {}]  }
   0x1   :  { %11 = vsyncpa [#allocation6], 0 }
   0x2   :  { %12 = vsyncpa [#allocation4], 0  ;;  %s484_s18 = smov [#allocation5]   ;;  %s390_s22 = scalar_lea.hbm %s583_s1, 1024 }
   0x3   :  { %s28_s19 = sshll.u32 %s484_s18, 4  ;;  %p391_p0 = scmp.ne.s32.totalorder %s583_s1, %s390_s22  ;;  %s29_s19 = int_to_ptr.vmem [resolvable:$true] %s28_s19 }
   0x4   :  { %p394_p1 = scmp.lt.u32.totalorder %s390_s22, %s583_s1 }
   0x6   :  { %p396_p2 = pnand %p394_p1, %p391_p0 }
   0x8   :  { %399 = shalt.err (!%p396_p2)
}
   0x9   :  { %s400_s27 = scalar_lea.vmem %s29_s19, 1024  ;;  %p405_p4 = scmp.lt.s32.totalorder %s29_s19, %s29_s19 }
   0xa   :  { %p401_p3 = scmp.ne.s32.totalorder %s29_s19, %s400_s27  ;;  %p406_p5 = scmp.lt.s32.totalorder %s400_s27, %s400_s27 }
   0xc   :  { %p407_p6 = por %p406_p5, %p405_p4 }
   0xe   :  { %p408_p7 = pnand %p407_p6, %p401_p3 }
  0x10   :  { %411 = shalt.err (!%p408_p7)
}
  0x11   :  { %s485_s28 = smov 256   ;;  %s486_s29 = smov 16  }
  0x12   :  { %34 = dma.hbm_to_vmem [thread:$0]  %s583_s1, 1024, %s29_s19, [#allocation6], %s485_s28, %s485_s28, %s486_s29  }
  0x13   :  { %s487_s7 = smov [#allocation2]   ;;  %s488_s9 = smov [#allocation7]  }
  0x14   :  { %s19_s8 = sshll.u32 %s487_s7, 4  ;;  %s42_s10 = sshll.u32 %s488_s9, 4  ;;  %s20_s8 = int_to_ptr.vmem [resolvable:$true] %s19_s8  ;;  %s43_s10 = int_to_ptr.vmem [resolvable:$true] %s42_s10 }
  0x15   :  { %s412_s13 = scalar_lea.hbm %s582_s0, 32 }
  0x16   :  { %p413_p8 = scmp.ne.s32.totalorder %s582_s0, %s412_s13  ;;  %p416_p9 = scmp.lt.u32.totalorder %s412_s13, %s582_s0 }
  0x18   :  { %p418_p10 = pnand %p416_p9, %p413_p8 }
  0x1a   :  { %421 = shalt.err (!%p418_p10)
}
  0x1b   :  { %s422_s1 = scalar_lea.vmem %s20_s8, 32  ;;  %p427_p12 = scmp.lt.s32.totalorder %s20_s8, %s20_s8 }
  0x1c   :  { %p423_p11 = scmp.ne.s32.totalorder %s20_s8, %s422_s1  ;;  %p428_p13 = scmp.lt.s32.totalorder %s422_s1, %s422_s1 }
  0x1e   :  { %p429_p0 = por %p428_p13, %p427_p12 }
  0x20   :  { %p430_p1 = pnand %p429_p0, %p423_p11 }
  0x22   :  { %433 = shalt.err (!%p430_p1)
}
  0x23   :  { %22 = dma.hbm_to_vmem [thread:$0]  %s582_s0, 32, %s20_s8, [#allocation3]  }
  0x24   :  { %s434_s22 = scalar_lea.hbm %s585_s3, 6144 }
  0x25   :  { %p435_p2 = scmp.ne.s32.totalorder %s585_s3, %s434_s22  ;;  %p438_p3 = scmp.lt.u32.totalorder %s434_s22, %s585_s3 }
  0x27   :  { %p440_p4 = pnand %p438_p3, %p435_p2 }
  0x29   :  { %443 = shalt.err (!%p440_p4)
}
  0x2a   :  { %s444_s27 = scalar_lea.vmem %s43_s10, 6144  ;;  %p449_p6 = scmp.lt.s32.totalorder %s43_s10, %s43_s10 }
  0x2b   :  { %p445_p5 = scmp.ne.s32.totalorder %s43_s10, %s444_s27  ;;  %p450_p7 = scmp.lt.s32.totalorder %s444_s27, %s444_s27 }
  0x2d   :  { %p451_p8 = por %p450_p7, %p449_p6 }
  0x2f   :  { %p452_p9 = pnand %p451_p8, %p445_p5 }
  0x31   :  { %455 = shalt.err (!%p452_p9)
}
  0x32   :  { %48 = dma.hbm_to_vmem [thread:$0]  %s585_s3, 6144, %s43_s10, [#allocation6], %s485_s28, %s485_s28, %s486_s29  }
  0x33   :  { %478 = dma.done.wait [#allocation3], 32  }
  0x34   :  { %479 = vsyncadd [#allocation3], 4294967264 }
  0x35   :  { %480 = dma.done.wait [#allocation6], 7168  }
  0x36   :  { %481 = vsyncadd [#allocation6], 4294960128  ;;  %v489_v0 = vmov 0.0   ;;  %v62_v1 = vld [vmem:[#allocation5 + $0x8] sm:$0xff]  ;;  %v64_v2 = vld [vmem:[#allocation5 + $0x18] sm:$0xff]  ;;  %vm81_vm0 = vcmask 261120  }
  0x37   :  { %149 = vmatprep.mubr.f32.mxu0 %v489_v0  ;;  %v61_v3 = vld [vmem:[#allocation5] sm:$0xff]  ;;  %v326_v4 = vpack.c.bf16 %v64_v2, %v62_v1  ;;  %v63_v5 = vld [vmem:[#allocation5 + $0x10] sm:$0xff]  ;;  %v66_v6 = vld [vmem:[#allocation5 + $0x28] sm:$0xff]  ;;  %vm218_vm1 = vcmask 523264   ;;  %vm304_vm2 = vcmask 1041408   ;;  %vm305_vm3 = vcmask 519170  }
  0x38   :  { %v68_v7 = vld [vmem:[#allocation5 + $0x38] sm:$0xff]  ;;  %v328_v8 = vpack.c.bf16 %v63_v5, %v61_v3  ;;  %v65_v10 = vld [vmem:[#allocation5 + $0x20] sm:$0xff]  ;;  %v67_v11 = vld [vmem:[#allocation5 + $0x30] sm:$0xff] }
  0x39   :  { %v330_v9 = vpack.c.bf16 %v68_v7, %v66_v6  ;;  %327 = vmatprep.subr.bf16.mxu0 %v326_v4  ;;  %v159_v12 = vld [vmem:[#allocation7 + $0x8] sm:$0xff]  ;;  %v161_v13 = vld [vmem:[#allocation7 + $0x18] sm:$0xff]  ;;  %v158_v14 = vld [vmem:[#allocation7] sm:$0xff]  ;;  %v332_v15 = vpack.c.bf16 %v67_v11, %v65_v10 }
  0x3a   :  { %329 = vmatpush1.bf16.msra.mxu0 %v328_v8  ;;  %v334_v16 = vpack.c.bf16 %v161_v13, %v159_v12  ;;  %v160_v17 = vld [vmem:[#allocation7 + $0x10] sm:$0xff]  ;;  %v163_v18 = vld [vmem:[#allocation7 + $0x28] sm:$0xff]  ;;  %v165_v19 = vld [vmem:[#allocation7 + $0x38] sm:$0xff] }
  0x3b   :  { %331 = vmatprep.subr.bf16.mxu0 %v330_v9  ;;  %v336_v20 = vpack.c.bf16 %v160_v17, %v158_v14  ;;  %v338_v21 = vpack.c.bf16 %v165_v19, %v163_v18  ;;  %v162_v22 = vld [vmem:[#allocation7 + $0x20] sm:$0xff]  ;;  %v164_v23 = vld [vmem:[#allocation7 + $0x30] sm:$0xff]  ;;  %v167_v24 = vld [vmem:[#allocation7 + $0x48] sm:$0xff] }
  0x3c   :  { %335 = vmatprep.subr.bf16.mxu1 %v334_v16  ;;  %v169_v25 = vld [vmem:[#allocation7 + $0x58] sm:$0xff]  ;;  %v340_v26 = vpack.c.bf16 %v164_v23, %v162_v22  ;;  %v166_v29 = vld [vmem:[#allocation7 + $0x40] sm:$0xff]  ;;  %v168_v30 = vld [vmem:[#allocation7 + $0x50] sm:$0xff]  ;;  %v71_v22 = vlaneseq }
  0x3d   :  { %337 = vmatpush1.bf16.msra.mxu1 %v336_v20  ;;  %v60_v27 = vld [vmem:[#allocation2] sm:$0x3]  ;;  %v342_v28 = vpack.c.bf16 %v169_v25, %v167_v24  ;;  %v171_v31 = vld [vmem:[#allocation7 + $0x68] sm:$0xff]  ;;  %v344_v33 = vpack.c.bf16 %v168_v30, %v166_v29  ;;  %v170_v35 = vld [vmem:[#allocation7 + $0x60] sm:$0xff] }
  0x3e   :  { %333 = vmatpush1.bf16.msra.mxu0 %v332_v15  ;;  %339 = vmatprep.subr.bf16.mxu1 %v338_v21  ;;  %v173_v32 = vld [vmem:[#allocation7 + $0x78] sm:$0xff]  ;;  %v172_v36 = vld [vmem:[#allocation7 + $0x70] sm:$0xff]  ;;  %v175_v37 = vld [vmem:[#allocation7 + $0x88] sm:$0xff]  ;;  %v72_v23 = vshrl.u32 %v71_v22, 7 }
  0x3f   :  { %v346_v34 = vpack.c.bf16 %v173_v32, %v171_v31  ;;  %v177_v38 = vld [vmem:[#allocation7 + $0x98] sm:$0xff]  ;;  %v348_v39 = vpack.c.bf16 %v172_v36, %v170_v35  ;;  %v174_v41 = vld [vmem:[#allocation7 + $0x80] sm:$0xff]  ;;  %v176_v42 = vld [vmem:[#allocation7 + $0x90] sm:$0xff]  ;;  %v490_v36 = vmov 1983009808  }
  0x40   :  { %v350_v40 = vpack.c.bf16 %v177_v38, %v175_v37  ;;  %v179_v43 = vld [vmem:[#allocation7 + $0xa8] sm:$0xff]  ;;  %v181_v44 = vld [vmem:[#allocation7 + $0xb8] sm:$0xff]  ;;  %v352_v45 = vpack.c.bf16 %v176_v42, %v174_v41  ;;  %v178_v47 = vld [vmem:[#allocation7 + $0xa0] sm:$0xff]  ;;  %v73_v24 = vsub.s32 0, %v72_v23  ;;  %v297_v37 = vunpack.c.l.s4 %v490_v36 }
  0x41   :  { %324 = vmatmul.mubr.msk.f32.vlgmr.msra.gmra.mrb[0].mxu0 %vm81_vm0, %v60_v27  ;;  %341 = vmatpush1.bf16.msra.mxu1 %v340_v26  ;;  %v354_v46 = vpack.c.bf16 %v181_v44, %v179_v43  ;;  %v180_v48 = vld [vmem:[#allocation7 + $0xb0] sm:$0xff]  ;;  %v183_v49 = vld [vmem:[#allocation7 + $0xc8] sm:$0xff]  ;;  %v185_v50 = vld [vmem:[#allocation7 + $0xd8] sm:$0xff]  ;;  %v77_v26 = vsub.s32 1, %v72_v23 }
  0x42   :  { %343 = vmatprep.subr.bf16.mxu1 %v342_v28  ;;  %v356_v51 = vpack.c.bf16 %v180_v48, %v178_v47  ;;  %v358_v52 = vpack.c.bf16 %v185_v50, %v183_v49  ;;  %v182_v53 = vld [vmem:[#allocation7 + $0xc0] sm:$0xff]  ;;  %v184_v54 = vld [vmem:[#allocation7 + $0xd0] sm:$0xff]  ;;  %v187_v55 = vld [vmem:[#allocation7 + $0xe8] sm:$0xff] }
  0x43   :  { %v189_v56 = vld [vmem:[#allocation7 + $0xf8] sm:$0xff]  ;;  %v360_v57 = vpack.c.bf16 %v184_v54, %v182_v53  ;;  %v186_v59 = vld [vmem:[#allocation7 + $0xe0] sm:$0xff]  ;;  %v188_v60 = vld [vmem:[#allocation7 + $0xf0] sm:$0xff] }
  0x44   :  { %v362_v58 = vpack.c.bf16 %v189_v56, %v187_v55  ;;  %v191_v61 = vld [vmem:[#allocation7 + $0x108] sm:$0xff]  ;;  %v193_v62 = vld [vmem:[#allocation7 + $0x118] sm:$0xff]  ;;  %v364_v63 = vpack.c.bf16 %v188_v60, %v186_v59  ;;  %v190_v1 = vld [vmem:[#allocation7 + $0x100] sm:$0xff] }
  0x45   :  { %345 = vmatpush1.bf16.msra.mxu1 %v344_v33  ;;  %v366_v0 = vpack.c.bf16 %v193_v62, %v191_v61  ;;  %v192_v2 = vld [vmem:[#allocation7 + $0x110] sm:$0xff]  ;;  %v195_v3 = vld [vmem:[#allocation7 + $0x128] sm:$0xff]  ;;  %v197_v4 = vld [vmem:[#allocation7 + $0x138] sm:$0xff] }
  0x46   :  { %347 = vmatprep.subr.bf16.mxu1 %v346_v34  ;;  %v368_v5 = vpack.c.bf16 %v192_v2, %v190_v1  ;;  %v370_v6 = vpack.c.bf16 %v197_v4, %v195_v3  ;;  %v194_v7 = vld [vmem:[#allocation7 + $0x120] sm:$0xff]  ;;  %v196_v8 = vld [vmem:[#allocation7 + $0x130] sm:$0xff]  ;;  %v199_v9 = vld [vmem:[#allocation7 + $0x148] sm:$0xff] }
  0x47   :  { %v201_v10 = vld [vmem:[#allocation7 + $0x158] sm:$0xff]  ;;  %v372_v11 = vpack.c.bf16 %v196_v8, %v194_v7  ;;  %v198_v13 = vld [vmem:[#allocation7 + $0x140] sm:$0xff]  ;;  %v200_v14 = vld [vmem:[#allocation7 + $0x150] sm:$0xff] }
  0x48   :  { %v374_v12 = vpack.c.bf16 %v201_v10, %v199_v9  ;;  %v376_v15 = vpack.c.bf16 %v200_v14, %v198_v13  ;;  %v203_v16 = vld [vmem:[#allocation7 + $0x168] sm:$0xff]  ;;  %v205_v17 = vld [vmem:[#allocation7 + $0x178] sm:$0xff]  ;;  %v202_v19 = vld [vmem:[#allocation7 + $0x160] sm:$0xff] }
  0x49   :  { %349 = vmatpush1.bf16.msra.mxu1 %v348_v39  ;;  %v378_v18 = vpack.c.bf16 %v205_v17, %v203_v16  ;;  %v204_v20 = vld [vmem:[#allocation7 + $0x170] sm:$0xff]  ;;  %v69_v25 = vld [vmem:[%s584_s2] sm:$0x3]  ;;  %s491_s2 = smov [#allocation8]   ;;  %vm306_vm4 = vmor %vm305_vm3, %vm304_vm2 }
  0x4a   :  { %351 = vmatprep.subr.bf16.mxu1 %v350_v40  ;;  %v380_v21 = vpack.c.bf16 %v204_v20, %v202_v19  ;;  %v74_v27 = vrot.slane %v69_v25, %v73_v24  ;;  %v78_v28 = vrot.slane %v69_v25, %v77_v26  ;;  %v206_v35 = vld [vmem:[%s586_s4] sm:$0x3]  ;;  %v298_v40 = vunpack.c.0.s8 %v297_v37  ;;  %s314_s7 = sshll.u32 %s491_s2, 4  ;;  %s315_s7 = int_to_ptr.vmem [resolvable:$true] %s314_s7 }
  0x4b   :  { %v211_v38 = vrot.slane %v206_v35, %v73_v24  ;;  %v215_v39 = vrot.slane %v206_v35, %v77_v26  ;;  %s456_s4 = scalar_lea.vmem %s315_s7, 64  ;;  %p461_p11 = scmp.lt.s32.totalorder %s315_s7, %s315_s7 }
  0x4c   :  { %p457_p10 = scmp.ne.s32.totalorder %s315_s7, %s456_s4  ;;  %p462_p12 = scmp.lt.s32.totalorder %s456_s4, %s456_s4 }
  0x4d   :  { %353 = vmatpush1.bf16.msra.mxu1 %v352_v45  ;;  %v301_v45 = vsub.s32 %v298_v40, %v72_v23 }
  0x4e   :  { %355 = vmatprep.subr.bf16.mxu1 %v354_v46  ;;  %p463_p13 = por %p462_p12, %p461_p11 }
  0x50   :  { %p464_p0 = pnand %p463_p13, %p457_p10 }
  0x51   :  { %357 = vmatpush1.bf16.msra.mxu1 %v356_v51 }
  0x52   :  { %359 = vmatprep.subr.bf16.mxu1 %v358_v52 }
  0x55   :  { %361 = vmatpush1.bf16.msra.mxu1 %v360_v57 }
  0x56   :  { %363 = vmatprep.subr.bf16.mxu1 %v362_v58 }
  0x59   :  { %365 = vmatpush1.bf16.msra.mxu1 %v364_v63 }
  0x5a   :  { %367 = vmatprep.subr.bf16.mxu1 %v366_v0 }
  0x5d   :  { %369 = vmatpush1.bf16.msra.mxu1 %v368_v5 }
  0x5e   :  { %371 = vmatprep.subr.bf16.mxu1 %v370_v6 }
  0x61   :  { %373 = vmatpush1.bf16.msra.mxu1 %v372_v11 }
  0x62   :  { %375 = vmatprep.subr.bf16.mxu1 %v374_v12 }
  0x65   :  { %377 = vmatpush1.bf16.msra.mxu1 %v376_v15 }
  0x66   :  { %379 = vmatprep.subr.bf16.mxu1 %v378_v18 }
  0x69   :  { %381 = vmatpush1.bf16.msra.mxu1 %v380_v21 }
 0x114   :  { %v151_v29 = vpop.f32.mrb[0].mxu0 }
 0x115   :  { %v152_v30 = vadd.f32 %v151_v29, %v74_v27  ;;  %v153_v31 = vpop.f32.mrb[1].mxu0 }
 0x116   :  { %v154_v32 = vadd.f32 %v153_v31, %v78_v28 }
 0x117   :  { %v156_v34 = vmax.f32 %v152_v30, 0.0 }
 0x118   :  { %v157_v33 = vmax.f32 %v154_v32, 0.0 }
 0x11a   :  { %325 = vmatprep.mubr.msk.f32.mxu1 %vm218_vm1, %v157_v33 }
 0x11b   :  { %287 = vmatmul.mubr.f32.vlgmr.msra.gmra.mrb[0].mxu1 %v156_v34 }
 0x1ee   :  { %v288_v41 = vpop.f32.mrb[0].mxu1 }
 0x1ef   :  { %v289_v42 = vadd.f32 %v288_v41, %v211_v38  ;;  %v290_v43 = vpop.f32.mrb[1].mxu1 }
 0x1f0   :  { %v291_v44 = vadd.f32 %v290_v43, %v215_v39 }
 0x1f2   :  { %v295_v46 = vcombine.low %v289_v42, %v291_v44 }
 0x1f4   :  { %v302_v47 = vrot.slane %v295_v46, %v301_v45 }
 0x1f6   :  { %307 = vst.msk [vmem:[#allocation8] sm:$0xf] %vm306_vm4, %v302_v47 }
 0x1f7   :  { %467 = shalt.err (!%p464_p0)
}
 0x1f8   :  { %s468_s10 = scalar_lea.hbm %s587_s5, 64 }
 0x1f9   :  { %p469_p1 = scmp.ne.s32.totalorder %s587_s5, %s468_s10  ;;  %p472_p2 = scmp.lt.u32.totalorder %s468_s10, %s587_s5 }
 0x1fb   :  { %p474_p3 = pnand %p472_p2, %p469_p1 }
 0x1fd   :  { %477 = shalt.err (!%p474_p3)
}
 0x1fe   :  { %317 = dma.vmem_to_hbm [thread:$0]  %s315_s7, 64, %s587_s5, [#allocation4]  }
 0x1ff   :  { %482 = dma.done.wait [#allocation4], 64  }
 0x200   :  { %483 = vsyncadd [#allocation4], 4294967232 }
 0x201   :  { %321 = vsyncpa [#allocation3], 1 }
 0x202   :  { %322 = vsyncpa [#allocation6], 1 }
 0x203   :  { %323 = vsyncpa [#allocation4], 1 }

</bundles_post_ra>
